<compile_context>
chip_gen: v5e
topology: v5e:2x2
jax: 0.10.0
libtpu: 0.0.40
codegen_flags: <defaults>
</compile_context>

<pallas_src>
import functools

import jax
import jax.numpy as jnp
from jax.experimental import pallas as pl
from jax.experimental.pallas import tpu as pltpu


def _round_up(x, m):
    return (x + m - 1) // m * m


def head_kernel(x_ref, w1_ref, b1_ref, w2_ref, b2_ref, w3_ref, b3_ref,
                o_ref, acc_ref):
    k = pl.program_id(0)

    # Zero the (B, H) accumulator on the first K tile.
    @pl.when(k == 0)
    def _():
        acc_ref[...] = jnp.zeros_like(acc_ref)

    # fc1 partial product for this K tile: bf16 inputs, f32 accumulation.
    acc_ref[...] += jnp.dot(x_ref[...], w1_ref[...],
                            preferred_element_type=jnp.float32)

    # Epilogue: bias + ReLU + fc2 + ReLU + classifier, only after the full
    # reduction (applying bias/ReLU per K step would be wrong).
    @pl.when(k == pl.num_programs(0) - 1)
    def _():
        h1 = jnp.maximum(acc_ref[...] + b1_ref[...], 0.0)
        h2 = jnp.dot(h1, w2_ref[...],
                     preferred_element_type=jnp.float32) + b2_ref[...]
        h2 = jnp.maximum(h2, 0.0)
        out = jnp.dot(h2, w3_ref[...],
                      preferred_element_type=jnp.float32) + b3_ref[...]
        o_ref[...] = out.astype(o_ref.dtype)


def caption_discriminator_head(x, w1, b1, w2, b2, w3, b3, *, tk):
    """x: (B, F_pad) bf16, w1: (F_pad, H) bf16, everything else f32."""
    B, F_pad = x.shape
    F_w, H = w1.shape
    C = w3.shape[1]
    assert F_w == F_pad and F_pad % tk == 0, (F_pad, F_w, tk)
    n_k = F_pad // tk

    grid_spec = pltpu.PrefetchScalarGridSpec(
        num_scalar_prefetch=0,
        grid=(n_k,),
        in_specs=[
            pl.BlockSpec((B, tk), lambda k: (0, k)),   # x     : walks K
            pl.BlockSpec((tk, H), lambda k: (k, 0)),   # w1    : walks K (streamed)
            pl.BlockSpec((1, H), lambda k: (0, 0)),    # b1    : resident
            pl.BlockSpec((H, H), lambda k: (0, 0)),    # w2    : resident
            pl.BlockSpec((1, H), lambda k: (0, 0)),    # b2    : resident
            pl.BlockSpec((H, C), lambda k: (0, 0)),    # w3    : resident
            pl.BlockSpec((1, C), lambda k: (0, 0)),    # b3    : resident
        ],
        out_specs=pl.BlockSpec((B, C), lambda k: (0, 0)),
        scratch_shapes=[pltpu.VMEM((B, H), jnp.float32)],
    )
    return pl.pallas_call(
        head_kernel,
        out_shape=jax.ShapeDtypeStruct((B, C), jnp.float32),
        grid_spec=grid_spec,
        compiler_params=pltpu.CompilerParams(
            dimension_semantics=("arbitrary",)),  # K is a reduction axis
    )(x, w1, b1, w2, b2, w3, b3)


def _init_linear(key, fan_in, fan_out):
    # deterministic PyTorch-style nn.Linear init: U(-1/sqrt(fan_in), 1/sqrt(fan_in))
    kw, kb = jax.random.split(key)
    bound = 1.0 / jnp.sqrt(jnp.float32(fan_in))
    w = jax.random.uniform(kw, (fan_in, fan_out), jnp.float32, -bound, bound)
    b = jax.random.uniform(kb, (1, fan_out), jnp.float32, -bound, bound)
    return w, b


def init_discriminator_params(key, F, hidden, num_candidates, tk):
    """fc1 weight is zero-padded to a K-tile multiple and stored in bf16 once."""
    F_pad = _round_up(F, tk)
    k_fc1, k_fc2, k_cls = jax.random.split(key, 3)
    w1, b1 = _init_linear(k_fc1, F, hidden)
    w1 = jnp.pad(w1, ((0, F_pad - F), (0, 0))).astype(jnp.bfloat16)
    w2, b2 = _init_linear(k_fc2, hidden, hidden)
    w3, b3 = _init_linear(k_cls, hidden, num_candidates)
    return (w1, b1, w2, b2, w3, b3)


@functools.partial(jax.jit, static_argnames=("tk",))
def caption_discriminator_forward(caption_feats, image_feat, params, *, tk):
    """caption_feats: (B, N, S_cap, D); image_feat: (B, S_img, D)."""
    B = caption_feats.shape[0]
    # Cast to bf16 first so the flatten/concat/pad that builds x only moves
    # half the bytes; the kernel consumes bf16 x anyway.
    caption_feats = caption_feats.astype(jnp.bfloat16)
    image_feat = image_feat.astype(jnp.bfloat16)
    # Flatten + concat (image first, then candidates 0..N-1).  A contiguous
    # reshape of caption_feats equals concatenating per-candidate flattens,
    # matching nn.Flatten + torch.cat(dim=1) exactly.
    x = jnp.concatenate(
        [image_feat.reshape(B, -1), caption_feats.reshape(B, -1)], axis=1)
    F = x.shape[1]
    F_pad = _round_up(F, tk)
    # Zero-pad the K axis to a tile multiple (the padded w1 rows are zero, so
    # the extra columns contribute nothing to the reduction).
    x = jnp.pad(x, ((0, 0), (0, F_pad - F)))
    w1, b1, w2, b2, w3, b3 = params
    return caption_discriminator_head(x, w1, b1, w2, b2, w3, b3, tk=tk)


if __name__ == "__main__":
    key = jax.random.PRNGKey(0)

    # small shapes consistent with the module's structure
    B = 2                        # batch
    num_candidates = 3           # number_of_candidates
    hidden = 32                  # hidden_layer_size
    S_cap, S_img, D = 8, 10, 32  # (orig: 512x768 caption, 197x768 image)
    TK = 512                     # 128-aligned K tile (use 16384..32768 at real F)

    k_cap, k_img, k_params = jax.random.split(key, 3)

    # TODO(synk): pretrained XLMRobertaModel / ViTModel extractors have no clean
    # Pallas equivalent; their last_hidden_state features are synthesized here.
    caption_feats = jax.random.normal(
        k_cap, (B, num_candidates, S_cap, D), jnp.float32)
    image_feat = jax.random.normal(k_img, (B, S_img, D), jnp.float32)

    F = S_img * D + num_candidates * S_cap * D      # fc1 input features (1088)
    params = init_discriminator_params(k_params, F, hidden, num_candidates, TK)

    out = caption_discriminator_forward(caption_feats, image_feat, params, tk=TK)
    out = jax.block_until_ready(out)
    assert out.shape == (B, num_candidates), out.shape

    # sanity check against a plain-JAX reference with the same bf16 fc1 path
    w1, b1, w2, b2, w3, b3 = params
    x_ref = jnp.concatenate(
        [image_feat.reshape(B, -1), caption_feats.reshape(B, -1)], axis=1)
    h = jnp.dot(x_ref.astype(jnp.bfloat16), w1[:F],
                preferred_element_type=jnp.float32) + b1
    h = jnp.maximum(h, 0.0)
    h = jnp.maximum(jnp.dot(h, w2, preferred_element_type=jnp.float32) + b2, 0.0)
    ref = jnp.dot(h, w3, preferred_element_type=jnp.float32) + b3
    assert jnp.allclose(out, ref, atol=2e-3, rtol=2e-3), (out, ref)

    print("KERNEL_OK")
</pallas_src>

<mosaic_0001>
module attributes {stable_mosaic.version = 11 : i64} {
  func.func @head_kernel(%arg0: i32, %arg1: memref<2x512xbf16, #tpu.memory_space<vmem>>, %arg2: memref<512x32xbf16, #tpu.memory_space<vmem>>, %arg3: memref<1x32xf32, #tpu.memory_space<vmem>>, %arg4: memref<32x32xf32, #tpu.memory_space<vmem>>, %arg5: memref<1x32xf32, #tpu.memory_space<vmem>>, %arg6: memref<32x3xf32, #tpu.memory_space<vmem>>, %arg7: memref<1x3xf32, #tpu.memory_space<vmem>>, %arg8: memref<2x3xf32, #tpu.memory_space<vmem>>, %arg9: memref<2x32xf32, #tpu.memory_space<vmem>>) attributes {dimension_semantics = [#tpu.dimension_semantics<arbitrary>], iteration_bounds = array<i64: 3>, scalar_prefetch = 0 : i64, scratch_operands = 1 : i64, tpu.core_type = #tpu.core_type<tc>, window_params = [{transform_indices = @transform_0, window_bounds = array<i64: 2, 512>}, {transform_indices = @transform_1, window_bounds = array<i64: 512, 32>}, {pipeline_mode = #tpu.pipeline_mode<synchronous>, transform_indices = @transform_2, window_bounds = array<i64: 1, 32>}, {pipeline_mode = #tpu.pipeline_mode<synchronous>, transform_indices = @transform_3, window_bounds = array<i64: 32, 32>}, {pipeline_mode = #tpu.pipeline_mode<synchronous>, transform_indices = @transform_4, window_bounds = array<i64: 1, 32>}, {pipeline_mode = #tpu.pipeline_mode<synchronous>, transform_indices = @transform_5, window_bounds = array<i64: 32, 3>}, {pipeline_mode = #tpu.pipeline_mode<synchronous>, transform_indices = @transform_6, window_bounds = array<i64: 1, 3>}, {pipeline_mode = #tpu.pipeline_mode<synchronous>, transform_indices = @transform_7, window_bounds = array<i64: 2, 3>}]} {
    %c0_i32 = arith.constant 0 : i32
    %0 = arith.cmpi eq, %arg0, %c0_i32 : i32
    %1 = arith.extui %0 : i1 to i32
    %c0_i32_0 = arith.constant 0 : i32
    %2 = arith.cmpi ne, %1, %c0_i32_0 : i32
    scf.if %2 {
      %cst_9 = arith.constant 0.000000e+00 : f32
      %12 = vector.broadcast %cst_9 : f32 to vector<2x32xf32>
      %c0_10 = arith.constant 0 : index
      %c0_11 = arith.constant 0 : index
      %13 = vector.load %arg9[%c0_10, %c0_11] : memref<2x32xf32, #tpu.memory_space<vmem>>, vector<2x32xf32>
      tpu.vector_store %arg9[%c0_10, %c0_11], %12 {strides = array<i32>} : memref<2x32xf32, #tpu.memory_space<vmem>>, vector<2x32xf32>,
    } else {
    }
    %c0 = arith.constant 0 : index
    %c0_1 = arith.constant 0 : index
    %3 = vector.load %arg9[%c0, %c0_1] : memref<2x32xf32, #tpu.memory_space<vmem>>, vector<2x32xf32>
    %c0_2 = arith.constant 0 : index
    %c0_3 = arith.constant 0 : index
    %4 = vector.load %arg1[%c0_2, %c0_3] : memref<2x512xbf16, #tpu.memory_space<vmem>>, vector<2x512xbf16>
    %c0_4 = arith.constant 0 : index
    %c0_5 = arith.constant 0 : index
    %5 = vector.load %arg2[%c0_4, %c0_5] : memref<512x32xbf16, #tpu.memory_space<vmem>>, vector<512x32xbf16>
    %cst = arith.constant dense<0.000000e+00> : vector<2x32xf32>
    %6 = tpu.matmul %4, %5, %cst {dimension_numbers = #tpu.dot_dimension_numbers<[1], [0], [0], [1], [0, 0, 1, 1], [], []>} : vector<2x512xbf16>, vector<512x32xbf16>, vector<2x32xf32> -> vector<2x32xf32>
    %7 = arith.addf %3, %6 : vector<2x32xf32>
    %c0_6 = arith.constant 0 : index
    %c0_7 = arith.constant 0 : index
    %8 = vector.load %arg9[%c0_6, %c0_7] : memref<2x32xf32, #tpu.memory_space<vmem>>, vector<2x32xf32>
    tpu.vector_store %arg9[%c0_6, %c0_7], %7 {strides = array<i32>} : memref<2x32xf32, #tpu.memory_space<vmem>>, vector<2x32xf32>,
    %c2_i32 = arith.constant 2 : i32
    %9 = arith.cmpi eq, %arg0, %c2_i32 : i32
    %10 = arith.extui %9 : i1 to i32
    %c0_i32_8 = arith.constant 0 : i32
    %11 = arith.cmpi ne, %10, %c0_i32_8 : i32
    scf.if %11 {
      %c0_9 = arith.constant 0 : index
      %c0_10 = arith.constant 0 : index
      %12 = vector.load %arg9[%c0_9, %c0_10] : memref<2x32xf32, #tpu.memory_space<vmem>>, vector<2x32xf32>
      %c0_11 = arith.constant 0 : index
      %c0_12 = arith.constant 0 : index
      %13 = vector.load %arg3[%c0_11, %c0_12] : memref<1x32xf32, #tpu.memory_space<vmem>>, vector<1x32xf32>
      %14 = vector.broadcast %13 : vector<1x32xf32> to vector<2x32xf32>
      %15 = arith.addf %12, %14 : vector<2x32xf32>
      %cst_13 = arith.constant 0.000000e+00 : f32
      %16 = vector.broadcast %cst_13 : f32 to vector<2x32xf32>
      %17 = arith.maximumf %15, %16 : vector<2x32xf32>
      %c0_14 = arith.constant 0 : index
      %c0_15 = arith.constant 0 : index
      %18 = vector.load %arg4[%c0_14, %c0_15] : memref<32x32xf32, #tpu.memory_space<vmem>>, vector<32x32xf32>
      %cst_16 = arith.constant dense<0.000000e+00> : vector<2x32xf32>
      %19 = tpu.matmul %17, %18, %cst_16 {dimension_numbers = #tpu.dot_dimension_numbers<[1], [0], [0], [1], [0, 0, 1, 1], [], []>} : vector<2x32xf32>, vector<32x32xf32>, vector<2x32xf32> -> vector<2x32xf32>
      %c0_17 = arith.constant 0 : index
      %c0_18 = arith.constant 0 : index
      %20 = vector.load %arg5[%c0_17, %c0_18] : memref<1x32xf32, #tpu.memory_space<vmem>>, vector<1x32xf32>
      %21 = vector.broadcast %20 : vector<1x32xf32> to vector<2x32xf32>
      %22 = arith.addf %19, %21 : vector<2x32xf32>
      %cst_19 = arith.constant 0.000000e+00 : f32
      %23 = vector.broadcast %cst_19 : f32 to vector<2x32xf32>
      %24 = arith.maximumf %22, %23 : vector<2x32xf32>
      %c0_20 = arith.constant 0 : index
      %c0_21 = arith.constant 0 : index
      %25 = vector.load %arg6[%c0_20, %c0_21] : memref<32x3xf32, #tpu.memory_space<vmem>>, vector<32x3xf32>
      %cst_22 = arith.constant dense<0.000000e+00> : vector<2x3xf32>
      %26 = tpu.matmul %24, %25, %cst_22 {dimension_numbers = #tpu.dot_dimension_numbers<[1], [0], [0], [1], [0, 0, 1, 1], [], []>} : vector<2x32xf32>, vector<32x3xf32>, vector<2x3xf32> -> vector<2x3xf32>
      %c0_23 = arith.constant 0 : index
      %c0_24 = arith.constant 0 : index
      %27 = vector.load %arg7[%c0_23, %c0_24] : memref<1x3xf32, #tpu.memory_space<vmem>>, vector<1x3xf32>
      %28 = vector.broadcast %27 : vector<1x3xf32> to vector<2x3xf32>
      %29 = arith.addf %26, %28 : vector<2x3xf32>
      %c0_25 = arith.constant 0 : index
      %c0_26 = arith.constant 0 : index
      %30 = vector.load %arg8[%c0_25, %c0_26] : memref<2x3xf32, #tpu.memory_space<vmem>>, vector<2x3xf32>
      tpu.vector_store %arg8[%c0_25, %c0_26], %29 {strides = array<i32>} : memref<2x3xf32, #tpu.memory_space<vmem>>, vector<2x3xf32>,
    } else {
    }
    return
  }
  func.func @transform_0(%arg0: i32) -> (i32, i32) {
    %c0_i32 = arith.constant 0 : i32
    %c0_i32_0 = arith.constant 0 : i32
    return %c0_i32, %arg0 : i32, i32
  }
  func.func @transform_1(%arg0: i32) -> (i32, i32) {
    %c0_i32 = arith.constant 0 : i32
    %c0_i32_0 = arith.constant 0 : i32
    return %arg0, %c0_i32 : i32, i32
  }
  func.func @transform_2(%arg0: i32) -> (i32, i32) {
    %c0_i32 = arith.constant 0 : i32
    %c0_i32_0 = arith.constant 0 : i32
    %c0_i32_1 = arith.constant 0 : i32
    return %c0_i32, %c0_i32_0 : i32, i32
  }
  func.func @transform_3(%arg0: i32) -> (i32, i32) {
    %c0_i32 = arith.constant 0 : i32
    %c0_i32_0 = arith.constant 0 : i32
    %c0_i32_1 = arith.constant 0 : i32
    return %c0_i32, %c0_i32_0 : i32, i32
  }
  func.func @transform_4(%arg0: i32) -> (i32, i32) {
    %c0_i32 = arith.constant 0 : i32
    %c0_i32_0 = arith.constant 0 : i32
    %c0_i32_1 = arith.constant 0 : i32
    return %c0_i32, %c0_i32_0 : i32, i32
  }
  func.func @transform_5(%arg0: i32) -> (i32, i32) {
    %c0_i32 = arith.constant 0 : i32
    %c0_i32_0 = arith.constant 0 : i32
    %c0_i32_1 = arith.constant 0 : i32
    return %c0_i32, %c0_i32_0 : i32, i32
  }
  func.func @transform_6(%arg0: i32) -> (i32, i32) {
    %c0_i32 = arith.constant 0 : i32
    %c0_i32_0 = arith.constant 0 : i32
    %c0_i32_1 = arith.constant 0 : i32
    return %c0_i32, %c0_i32_0 : i32, i32
  }
  func.func @transform_7(%arg0: i32) -> (i32, i32) {
    %c0_i32 = arith.constant 0 : i32
    %c0_i32_0 = arith.constant 0 : i32
    %c0_i32_1 = arith.constant 0 : i32
    return %c0_i32, %c0_i32_0 : i32, i32
  }
}

</mosaic_0001>

<bundles_post_ra>
// kernel: caption_discriminator_forward.1
= control target key start
LH: loop header
LB: loop body
LE: loop exit
PB: predicated region body
PF: predicated region fallthrough
CT: control target
= control target key end

     0   :  { %12 = vsyncpa [#allocation4], 0  ;;  %s1025_s24 = smov 0   ;;  %s1127_s0 = inlined_call_operand.vmem [shape: bf16[2,1536], index: 0, kind: input, shape index: {}]   ;;  %s1128_s1 = inlined_call_operand.vmem [shape: bf16[1536,32], index: 1, kind: input, shape index: {}]   ;;  %s1129_s2 = inlined_call_operand.vmem [shape: f32[1,32], index: 2, kind: input, shape index: {}]   ;;  %s1130_s3 = inlined_call_operand.vmem [shape: f32[32,32], index: 3, kind: input, shape index: {}]   ;;  %s1131_s4 = inlined_call_operand.vmem [shape: f32[1,32], index: 4, kind: input, shape index: {}]   ;;  %s1132_s5 = inlined_call_operand.vmem [shape: f32[32,3], index: 5, kind: input, shape index: {}]   ;;  %s1133_s6 = inlined_call_operand.vmem [shape: f32[1,3], index: 6, kind: input, shape index: {}]   ;;  %s1134_s7 = inlined_call_operand.hbm [shape: f32[2,3], index: 7, kind: output, shape index: {}]  }
   0x1 LB: > { %s1031_s25 = sadd.s32 4294967295, %s981_s24   ;;  %p752_p0 = scmp.ge.s32.totalorder %s981_s24, 1  ;;  %s981_s24 = sphi %s1025_s24, %s18_s24  }
   0x2   : > { %p244_p1 = scmp.lt.s32.totalorder %s981_s24, 4 }
   0x4   : > { %p245_p2 = pnand %p752_p0, %p244_p1 }
   0x5   : > { %s753_s26 = sshll.u32 (!%p245_p2), %s1031_s25, 2  ;;  %s754_s27 = sshll.u32 (!%p245_p2), %s1031_s25, 6 }
   0x6   : > { %248 = sbr.rel (%p245_p2) target bundleno = 468 (0x1d4), region = 48  ;;  %p276_p3 = scmp.lt.s32.totalorder (!%p245_p2), %s753_s26, 11 }
   0x7   : > { %p281_p4 = scmp.lt.s32.totalorder (!%p245_p2), %s754_s27, 191  ;;  %p756_p5 = scmp.ne.s32.totalorder (!%p245_p2), %s1031_s25, 0 }
   0xb   : > { %s1136_s26 = smov (!%p276_p3, %s753_s26), 11  ;;  %s1138_s27 = smov (!%p281_p4, %s754_s27), 191 }
   0xc   : > { %s278_s30 = scalar_lea.vmem %s1127_s0, %s1136_s26  ;;  %s755_s8 = sshll.u32 %s1138_s27, 2 }
   0xd   : > { %s1046_s11 = scalar_lea.vmem %s1128_s1, %s755_s8  ;;  %289 = sbr.rel (%p756_p5) target bundleno = 20 (0x14), region = 52 }
  0x12   : > { %vm290_vm0 = vcmask 254976   ;;  %v983_v0 = vmov 0.0  }
  0x13   : > { %291 = vst.msk [vmem:[#allocation2] sm:$0x3] %vm290_vm0, %v983_v0 }
  0x14 PF: > { %v899_v1 = vld [vmem:[%s1046_s11 + $0x38] sm:$0xff]  ;;  %v898_v5 = vld [vmem:[%s1046_s11 + $0x30] sm:$0xff]  ;;  %v897_v9 = vld [vmem:[%s1046_s11 + $0x28] sm:$0xff]  ;;  %vm613_vm1 = vcmask 254976   ;;  %p885_p6 = scmp.ne.s32.totalorder %s1031_s25, 2 }
  0x15   : > { %v907_v2 = vld [vmem:[%s1046_s11 + $0x78] sm:$0xff]  ;;  %560 = vmatpush.bf16.msra.mxu0 %v899_v1  ;;  %v906_v6 = vld [vmem:[%s1046_s11 + $0x70] sm:$0xff]  ;;  %v905_v10 = vld [vmem:[%s1046_s11 + $0x68] sm:$0xff] }
  0x16   : > { %v915_v3 = vld [vmem:[%s1046_s11 + $0xb8] sm:$0xff]  ;;  %573 = vmatpush.bf16.msra.mxu1 %v907_v2  ;;  %v914_v7 = vld [vmem:[%s1046_s11 + $0xb0] sm:$0xff]  ;;  %v913_v11 = vld [vmem:[%s1046_s11 + $0xa8] sm:$0xff] }
  0x17   : > { %v923_v4 = vld [vmem:[%s1046_s11 + $0xf8] sm:$0xff]  ;;  %586 = vmatpush.bf16.msra.mxu2 %v915_v3  ;;  %v922_v8 = vld [vmem:[%s1046_s11 + $0xf0] sm:$0xff]  ;;  %v921_v12 = vld [vmem:[%s1046_s11 + $0xe8] sm:$0xff] }
  0x18   : > { %599 = vmatpush.bf16.msra.mxu3 %v923_v4  ;;  %v896_v13 = vld [vmem:[%s1046_s11 + $0x20] sm:$0xff]  ;;  %v895_v18 = vld [vmem:[%s1046_s11 + $0x18] sm:$0xff]  ;;  %v894_v22 = vld [vmem:[%s1046_s11 + $0x10] sm:$0xff] }
  0x19   : > { %561 = vmatpush.bf16.msra.mxu0 %v898_v5  ;;  %v904_v14 = vld [vmem:[%s1046_s11 + $0x60] sm:$0xff]  ;;  %v903_v19 = vld [vmem:[%s1046_s11 + $0x58] sm:$0xff]  ;;  %v902_v23 = vld [vmem:[%s1046_s11 + $0x50] sm:$0xff] }
  0x1a   : > { %574 = vmatpush.bf16.msra.mxu1 %v906_v6  ;;  %v293_v15 = vld [vmem:[%s278_s30] sm:$0xf]  ;;  %v911_v20 = vld [vmem:[%s1046_s11 + $0x98] sm:$0xff]  ;;  %v910_v24 = vld [vmem:[%s1046_s11 + $0x90] sm:$0xff] }
  0x1b   : > { %587 = vmatpush.bf16.msra.mxu2 %v914_v7  ;;  %v912_v16 = vld [vmem:[%s1046_s11 + $0xa0] sm:$0xff]  ;;  %359 = vst [vmem:[#allocation1] ss:$9 sm:$0xff] %v293_v15  ;;  %v919_v21 = vld [vmem:[%s1046_s11 + $0xd8] sm:$0xff]  ;;  %v918_v25 = vld [vmem:[%s1046_s11 + $0xd0] sm:$0xff] }
  0x1c   : > { %600 = vmatpush.bf16.msra.mxu3 %v922_v8  ;;  %v920_v17 = vld [vmem:[%s1046_s11 + $0xe0] sm:$0xff]  ;;  %v893_v26 = vld [vmem:[%s1046_s11 + $0x8] sm:$0xff] }
  0x1d   : > { %562 = vmatpush.bf16.msra.mxu0 %v897_v9  ;;  %v901_v27 = vld [vmem:[%s1046_s11 + $0x48] sm:$0xff]  ;;  %v892_v30 = vld [vmem:[%s1046_s11] sm:$0xff] }
  0x1e   : > { %575 = vmatpush.bf16.msra.mxu1 %v905_v10  ;;  %v909_v28 = vld [vmem:[%s1046_s11 + $0x88] sm:$0xff]  ;;  %v900_v31 = vld [vmem:[%s1046_s11 + $0x40] sm:$0xff] }
  0x1f   : > { %588 = vmatpush.bf16.msra.mxu2 %v913_v11  ;;  %v917_v29 = vld [vmem:[%s1046_s11 + $0xc8] sm:$0xff]  ;;  %v908_v32 = vld [vmem:[%s1046_s11 + $0x80] sm:$0xff] }
  0x20   : > { %601 = vmatpush.bf16.msra.mxu3 %v921_v12  ;;  %v916_v33 = vld [vmem:[%s1046_s11 + $0xc0] sm:$0xff]  ;;  %v292_v46 = vld [vmem:[#allocation2] sm:$0x3] }
  0x21   : > { %563 = vmatpush.bf16.msra.mxu0 %v896_v13 }
  0x22   : > { %576 = vmatpush.bf16.msra.mxu1 %v904_v14  ;;  %v360_v34 = vld [vmem:[#allocation1] sm:$0xff]  ;;  %v361_v35 = vld [vmem:[#allocation1 + $0x9] sm:$0xff]  ;;  %v362_v36 = vld [vmem:[#allocation1 + $0x12] sm:$0xff] }
  0x23   : > { %589 = vmatpush.bf16.msra.mxu2 %v912_v16  ;;  %v363_v37 = vld [vmem:[#allocation1 + $0x1b] sm:$0xff] }
  0x24   : > { %602 = vmatpush.bf16.msra.mxu3 %v920_v17 }
  0x25   : > { %564 = vmatpush.bf16.msra.mxu0 %v895_v18 }
  0x26   : > { %577 = vmatpush.bf16.msra.mxu1 %v903_v19 }
  0x27   : > { %590 = vmatpush.bf16.msra.mxu2 %v911_v20 }
  0x28   : > { %603 = vmatpush.bf16.msra.mxu3 %v919_v21 }
  0x29   : > { %565 = vmatpush.bf16.msra.mxu0 %v894_v22 }
  0x2a   : > { %578 = vmatpush.bf16.msra.mxu1 %v902_v23 }
  0x2b   : > { %591 = vmatpush.bf16.msra.mxu2 %v910_v24 }
  0x2c   : > { %604 = vmatpush.bf16.msra.mxu3 %v918_v25 }
  0x2d   : > { %566 = vmatpush.bf16.msra.mxu0 %v893_v26 }
  0x2e   : > { %579 = vmatpush.bf16.msra.mxu1 %v901_v27 }
  0x2f   : > { %592 = vmatpush.bf16.msra.mxu2 %v909_v28 }
  0x30   : > { %605 = vmatpush.bf16.msra.mxu3 %v917_v29 }
  0x31   : > { %567 = vmatpush.bf16.msra.mxu0 %v892_v30 }
  0x32   : > { %580 = vmatpush.bf16.msra.mxu1 %v900_v31 }
  0x33   : > { %593 = vmatpush.bf16.msra.mxu2 %v908_v32 }
  0x34   : > { %606 = vmatpush.bf16.msra.mxu3 %v916_v33  ;;  %568 = vmatmul.bf16.vlgmr.msra.gmra.mxu0 %v360_v34 }
  0x35   : > { %581 = vmatmul.bf16.vlgmr.msra.gmra.mxu1 %v361_v35 }
  0x36   : > { %594 = vmatmul.bf16.vlgmr.msra.gmra.mxu2 %v362_v36 }
  0x37   : > { %607 = vmatmul.bf16.vlgmr.msra.gmra.mxu3 %v363_v37 }
  0xb1   : > { %v569_v38 = vpop.f32.mrf.mxu0 }
  0xb2   : > { %v582_v39 = vpop.f32.mrf.mxu1 }
  0xb3   : > { %v583_v40 = vadd.f32 %v582_v39, %v569_v38 }
  0xb9   : > { %v595_v41 = vpop.f32.mrf.mxu2  ;;  %v571_v44 = vpop.f32.mrf.mxu0 }
  0xba   : > { %v608_v42 = vpop.f32.mrf.mxu3  ;;  %v596_v43 = vadd.f32 %v595_v41, %v583_v40  ;;  %v584_v45 = vpop.f32.mrf.mxu1 }
  0xbc   : > { %v609_v47 = vadd.f32 %v608_v42, %v596_v43 }
  0xbe   : > { %v612_v48 = vadd.f32 %v609_v47, %v292_v46  ;;  %618 = sbr.rel (%p885_p6) target bundleno = 463 (0x1cf), region = 56 }
  0xc0   : > { %614 = vst.msk [vmem:[#allocation2] sm:$0x3] %vm613_vm1, %v612_v48 }
  0xc1   : > { %v597_v49 = vpop.f32.mrf.mxu2 }
  0xc2   : > { %v610_v50 = vpop.f32.mrf.mxu3 }
  0xc3   : > { %v629_v51 = vld [vmem:[%s1130_s3 + $0x18] sm:$0xff]  ;;  %v628_v52 = vld [vmem:[%s1130_s3 + $0x10] sm:$0xff]  ;;  %v627_v53 = vld [vmem:[%s1130_s3 + $0x8] sm:$0xff]  ;;  %vm634_vm2 = vcmask 261120   ;;  %vm690_vm3 = vcmask 17408  }
  0xc4   : > { %650 = vmatpush.msra.mxu0 %v629_v51  ;;  %v940_v55 = vld [vmem:[%s1129_s2] ss:$0 sm:$0xff]  ;;  %v662_v56 = vld [vmem:[%s1132_s5 + $0x18] sm:$0xff]  ;;  %v661_v60 = vld [vmem:[%s1132_s5 + $0x10] sm:$0xff] }
  0xc5   : > { %682 = vmatpush.msra.mxu1 %v662_v56  ;;  %v626_v57 = vld [vmem:[%s1130_s3] sm:$0xff]  ;;  %v660_v61 = vld [vmem:[%s1132_s5 + $0x8] sm:$0xff] }
  0xc6   : > { %651 = vmatpush.msra.mxu0 %v628_v52  ;;  %v659_v62 = vld [vmem:[%s1132_s5] sm:$0xff] }
  0xc7   : > { %v619_v54 = vld [vmem:[#allocation2] sm:$0x3]  ;;  %683 = vmatpush.msra.mxu1 %v661_v60  ;;  %v941_v63 = vld [vmem:[%s1131_s4] ss:$0 sm:$0xff] }
  0xc8   : > { %v624_v58 = vadd.f32 %v940_v55, %v619_v54  ;;  %652 = vmatpush.msra.mxu0 %v627_v53  ;;  %v942_v3 = vld [vmem:[%s1133_s6] ss:$0 sm:$0xff] }
  0xc9   : > { %684 = vmatpush.msra.mxu1 %v660_v61 }
  0xca   : > { %v625_v59 = vmax.f32 %v624_v58, 0.0  ;;  %653 = vmatpush.msra.mxu0 %v626_v57 }
  0xcb   : > { %685 = vmatpush.msra.mxu1 %v659_v62 }
  0xcc   : > { %886 = vmatmul.msk.f32.vlgmr.msra.gmra.mxu0 %vm634_vm2, %v625_v59 }
 0x149   : > { %v655_v0 = vpop.f32.mrf.mxu0 }
 0x14a   : > { %v656_v1 = vadd.f32 %v941_v63, %v655_v0 }
 0x14c   : > { %v658_v2 = vmax.f32 %v656_v1, 0.0 }
 0x14e   : > { %887 = vmatmul.msk.f32.vlgmr.msra.gmra.mxu1 %vm634_vm2, %v658_v2 }
 0x1cb   : > { %v687_v4 = vpop.f32.mrf.mxu1 }
 0x1cc   : > { %v688_v5 = vadd.f32 %v942_v3, %v687_v4 }
 0x1ce   : > { %691 = vst.msk [vmem:[#allocation3] sm:$0x3] %vm690_vm3, %v688_v5 }
 0x1cf PF: > { %p928_p7 = scmp.eq.s32.totalorder %s1031_s25, 2  ;;  %s984_s15 = smov [#allocation3]  }
 0x1d0   : > { %s698_s16 = sshll.u32 %s984_s15, 4  ;;  %s700_s19 = sshll.u32 %s1134_s7, 4  ;;  %s699_s16 = int_to_ptr.vmem [resolvable:$true] %s698_s16  ;;  %s701_s19 = int_to_ptr.hbm [resolvable:$true] %s700_s19 }
 0x1d1   : > { %925 = dma.vmem_to_hbm [thread:$0]  (%p928_p7), %s699_s16, 32, %s701_s19, [#allocation4]  }
 0x1d2   : > { %976 = dma.done.wait (%p928_p7), [#allocation4], 32  }
 0x1d3   : > { %978 = vsyncadd (%p928_p7), [#allocation4], 4294967264 }
 0x1d4 PF: > { %s18_s24 = sadd.s32 1, %s981_s24  }
 0x1d5   : > { %p15_p8 = scmp.ge.s32.totalorder %s18_s24, 5  }
 0x1d7   :  { %17 = sbr.rel (!%p15_p8) target bundleno = 1 (0x1), region = 86 }
 0x1dc   :  { %714 = vsyncpa [#allocation4], 1 }
 0x1dd   :  { %716 = vsyncpa [#allocation4 + $0x1], 1 }

</bundles_post_ra>
